<compile_context>
chip_gen: v5e
topology: v5e:2x2
jax: 0.10.0
libtpu: 0.0.40
codegen_flags: <defaults>
</compile_context>

<pallas_src>
import jax
import jax.numpy as jnp
from jax import lax
from jax.experimental import pallas as pl
from jax.experimental.pallas import tpu as pltpu

_COMPILER_PARAMS = pltpu.CompilerParams(
    dimension_semantics=("parallel",),
    # <= 48 MiB scoped VMEM is safe on v7x (64 MiB physical) and fine on v5e/v6e
    # (128 MiB).  Per-step blocks here are <= ~3 MiB even double-buffered.
    vmem_limit_bytes=48 * 1024 * 1024,
)


def _round_up(x, m):
    return ((x + m - 1) // m) * m


def _pick_tile(m, target_steps=4, max_tile=1024):
    """Row-tile size: aim for >= `target_steps` grid steps (v7x dual-TC sharding +
    pipeline overlap), cap the tile, keep it a multiple of 8 sublanes."""
    t = -(-m // target_steps)  # ceil div
    return max(8, min(max_tile, _round_up(t, 8)))


# ---------------------------------------------------------------------------
# Pallas kernels
# ---------------------------------------------------------------------------
def _conv_relu_pool_kernel(p_ref, w_ref, b_ref, o_ref):
    """Fused conv (single matmul over all 4 pool positions) + bias + ReLU + 2x2 maxpool.

    p_ref: (4*tm, K) bf16   patch rows ordered (pool_position, output_row)
    w_ref: (K, OC)   bf16
    b_ref: (1, OC)   f32
    o_ref: (tm, OC)  bf16   pooled activation
    """
    tm = o_ref.shape[0]
    d = jnp.dot(p_ref[...], w_ref[...], preferred_element_type=jnp.float32)
    m = jnp.maximum(jnp.maximum(d[0:tm], d[tm:2 * tm]),
                    jnp.maximum(d[2 * tm:3 * tm], d[3 * tm:4 * tm]))
    # relu(max_p(d_p) + b) == max_p(relu(d_p + b)): bias is uniform over the window.
    o_ref[...] = jnp.maximum(m + b_ref[...], 0.0).astype(o_ref.dtype)


def conv_relu_pool(patches4, w_mat, bias):
    """patches4: (4, M, K) bf16 pool-grouped im2col rows -> (M, OC) bf16 pooled activation."""
    _, M, K = patches4.shape
    oc = w_mat.shape[1]
    tm = _pick_tile(M)
    Mp = _round_up(M, tm)
    if Mp != M:
        patches4 = jnp.pad(patches4, ((0, 0), (0, Mp - M), (0, 0)))
    nt = Mp // tm
    # Reorder rows to (tile, pool_pos, row) so every grid step sees ONE contiguous
    # (4*tm, K) slab -> a single MXU matmul instead of 4 short ones.
    p = patches4.reshape(4, nt, tm, K).transpose(1, 0, 2, 3).reshape(nt * 4 * tm, K)
    out = pl.pallas_call(
        _conv_relu_pool_kernel,
        out_shape=jax.ShapeDtypeStruct((Mp, oc), jnp.bfloat16),
        grid=(nt,),
        in_specs=[
            pl.BlockSpec((4 * tm, K), lambda i: (i, 0)),
            pl.BlockSpec((K, oc), lambda i: (0, 0)),
            pl.BlockSpec((1, oc), lambda i: (0, 0)),
        ],
        out_specs=pl.BlockSpec((tm, oc), lambda i: (i, 0)),
        compiler_params=_COMPILER_PARAMS,
    )(p, w_mat, bias)
    return out[:M]


def _fc_fused_kernel(x_ref, w1_ref, b1_ref, w2_ref, b2_ref, w3_ref, b3_ref, o_ref):
    """fc1+ReLU -> fc2+ReLU -> fc3 entirely in VMEM; intermediates never hit HBM."""
    h = jnp.dot(x_ref[...], w1_ref[...], preferred_element_type=jnp.float32)
    h = jnp.maximum(h + b1_ref[...], 0.0)
    h = jnp.dot(h.astype(jnp.bfloat16), w2_ref[...], preferred_element_type=jnp.float32)
    h = jnp.maximum(h + b2_ref[...], 0.0)
    h = jnp.dot(h.astype(jnp.bfloat16), w3_ref[...], preferred_element_type=jnp.float32)
    o_ref[...] = (h + b3_ref[...]).astype(o_ref.dtype)


def fc_fused(x, w1, b1, w2, b2, w3, b3):
    """x: (M, 576) bf16; unpadded weights (K, N) bf16, biases (1, N) f32 -> (M, 10) f32."""
    M = x.shape[0]
    tb = _pick_tile(M, target_steps=4, max_tile=512)
    Mp = _round_up(M, tb)
    if Mp != M:
        x = jnp.pad(x, ((0, Mp - M), (0, 0)))
    out = pl.pallas_call(
        _fc_fused_kernel,
        out_shape=jax.ShapeDtypeStruct((Mp, w3.shape[1]), jnp.float32),
        grid=(Mp // tb,),
        in_specs=[
            pl.BlockSpec((tb, x.shape[1]), lambda i: (i, 0)),
            pl.BlockSpec(w1.shape, lambda i: (0, 0)),
            pl.BlockSpec(b1.shape, lambda i: (0, 0)),
            pl.BlockSpec(w2.shape, lambda i: (0, 0)),
            pl.BlockSpec(b2.shape, lambda i: (0, 0)),
            pl.BlockSpec(w3.shape, lambda i: (0, 0)),
            pl.BlockSpec(b3.shape, lambda i: (0, 0)),
        ],
        out_specs=pl.BlockSpec((tb, w3.shape[1]), lambda i: (i, 0)),
        compiler_params=_COMPILER_PARAMS,
    )(x, w1, b1, w2, b2, w3, b3)
    return out[:M]


# ---------------------------------------------------------------------------
# XLA glue: pool-window-grouped im2col (stride-2 pool folded into slice starts)
# ---------------------------------------------------------------------------
def pool_window_patches(x, kh, kw, pad, k_pad_to=16):
    """x: (N, H, W, C) -> (4, N*ph*pw, Kp) bf16 pool-grouped patches, ph/pw pooled dims.

    Axis 0 enumerates the 4 conv-output positions of each 2x2 maxpool window.  The
    stride-2 subsample is applied directly in the slice starts, so the un-pooled
    patch tensor is never materialized.  K = kh*kw*C is padded only minimally
    (multiple of `k_pad_to`), not to 128.  Feature order is (kh, kw, c).
    """
    x = x.astype(jnp.bfloat16)
    if pad:
        x = jnp.pad(x, ((0, 0), (pad, pad), (pad, pad), (0, 0)))
    n, h, w, c = x.shape
    oh, ow = h - kh + 1, w - kw + 1
    ph, pw = oh // 2, ow // 2
    k = kh * kw * c
    slabs = []
    for rl in (0, 1):
        for cl in (0, 1):
            taps = [x[:, rl + ki: rl + ki + 2 * ph: 2, cl + kj: cl + kj + 2 * pw: 2, :]
                    for ki in range(kh) for kj in range(kw)]
            pat = jnp.stack(taps, axis=3)                    # (n, ph, pw, kh*kw, c)
            slabs.append(pat.reshape(n * ph * pw, k))
    pat4 = jnp.stack(slabs, axis=0)                          # (4, M, K)
    kp = _round_up(k, k_pad_to)
    if kp != k:
        pat4 = jnp.pad(pat4, ((0, 0), (0, 0), (0, kp - k)))
    return pat4, ph, pw


# ---------------------------------------------------------------------------
# Parameters: PyTorch-layout init + one-time kernel-layout preparation
# ---------------------------------------------------------------------------
def init_torch_params(key):
    def uinit(k, shape, fan_in):
        bound = 1.0 / (fan_in ** 0.5)
        return jax.random.uniform(k, shape, jnp.float32, -bound, bound)

    ks = jax.random.split(key, 10)
    return {
        "conv1_w": uinit(ks[0], (6, 1, 5, 5), 1 * 5 * 5),
        "conv1_b": uinit(ks[1], (6,), 1 * 5 * 5),
        "conv2_w": uinit(ks[2], (16, 6, 5, 5), 6 * 5 * 5),
        "conv2_b": uinit(ks[3], (16,), 6 * 5 * 5),
        "fc1_w": uinit(ks[4], (120, 576), 576),
        "fc1_b": uinit(ks[5], (120,), 576),
        "fc2_w": uinit(ks[6], (84, 120), 120),
        "fc2_b": uinit(ks[7], (84,), 120),
        "fc3_w": uinit(ks[8], (10, 84), 84),
        "fc3_b": uinit(ks[9], (10,), 84),
    }


def _conv_wmat(w, k_pad_to=16):
    """(OC, IC, KH, KW) torch conv weight -> (Kp, OC) bf16, rows ordered (kh, kw, ic)."""
    oc, ic, kh, kw = w.shape
    m = w.transpose(2, 3, 1, 0).reshape(kh * kw * ic, oc)
    kp = _round_up(kh * kw * ic, k_pad_to)
    if kp != m.shape[0]:
        m = jnp.pad(m, ((0, kp - m.shape[0]), (0, 0)))
    return m.astype(jnp.bfloat16)


def _bias_row(b):
    return b.reshape(1, -1).astype(jnp.float32)


def prepare_params(tp):
    """One-time conversion: transpose to (K, N), minimal padding, bf16 weights."""
    # fc1 columns are indexed (c, h, w) in torch's NCHW flatten; permute them to
    # (h, w, c) so the NHWC pooled activation flattens directly.
    fc1 = tp["fc1_w"].reshape(120, 16, 6, 6).transpose(0, 2, 3, 1).reshape(120, 576)
    return {
        "c1_w": _conv_wmat(tp["conv1_w"]),                    # (32, 6)
        "c1_b": _bias_row(tp["conv1_b"]),                     # (1, 6)
        "c2_w": _conv_wmat(tp["conv2_w"]),                    # (160, 16)
        "c2_b": _bias_row(tp["conv2_b"]),                     # (1, 16)
        "fc1_w": fc1.T.astype(jnp.bfloat16),                  # (576, 120)
        "fc1_b": _bias_row(tp["fc1_b"]),
        "fc2_w": tp["fc2_w"].T.astype(jnp.bfloat16),          # (120, 84)
        "fc2_b": _bias_row(tp["fc2_b"]),
        "fc3_w": tp["fc3_w"].T.astype(jnp.bfloat16),          # (84, 10)
        "fc3_b": _bias_row(tp["fc3_b"]),
    }


# ---------------------------------------------------------------------------
# Forward pass
# ---------------------------------------------------------------------------
@jax.jit
def cnn_forward(kp, x_nchw):
    """x_nchw: (N, 1, 32, 32) — PyTorch NCHW convention. Returns (N, 10) f32 logits."""
    n = x_nchw.shape[0]
    x = jnp.transpose(x_nchw, (0, 2, 3, 1))                   # NHWC (N, 32, 32, 1)

    # conv1 (k5, pad2) + ReLU + 2x2 pool, fused (one matmul per tile over 4 pool slabs)
    p1, ph1, pw1 = pool_window_patches(x, 5, 5, pad=2)        # (4, N*256, 32)
    y1 = conv_relu_pool(p1, kp["c1_w"], kp["c1_b"])           # (N*256, 6) bf16
    y1 = y1.reshape(n, ph1, pw1, 6)                           # (N, 16, 16, 6)

    # conv2 (k5, pad0) + ReLU + 2x2 pool, fused
    p2, ph2, pw2 = pool_window_patches(y1, 5, 5, pad=0)       # (4, N*36, 160)
    y2 = conv_relu_pool(p2, kp["c2_w"], kp["c2_b"])           # (N*36, 16) bf16

    # Flatten in (h, w, c) order (fc1 columns pre-permuted to match torch's NCHW view)
    flat = y2.reshape(n, ph2 * pw2 * 16)                      # (N, 576) bf16
    return fc_fused(flat,
                    kp["fc1_w"], kp["fc1_b"],
                    kp["fc2_w"], kp["fc2_b"],
                    kp["fc3_w"], kp["fc3_b"])                 # (N, 10) f32


# ---------------------------------------------------------------------------
# Pure-JAX reference (mirrors the kernel's bf16 operand rounding for a tight check)
# ---------------------------------------------------------------------------
def _bf16(a):
    return a.astype(jnp.bfloat16).astype(jnp.float32)


def reference_forward(tp, x):
    dn = ("NCHW", "OIHW", "NCHW")
    y = lax.conv_general_dilated(_bf16(x), _bf16(tp["conv1_w"]), (1, 1),
                                 [(2, 2), (2, 2)], dimension_numbers=dn)
    y = jax.nn.relu(y + tp["conv1_b"][None, :, None, None])
    y = lax.reduce_window(y, -jnp.inf, lax.max, (1, 1, 2, 2), (1, 1, 2, 2), "VALID")
    y = lax.conv_general_dilated(_bf16(y), _bf16(tp["conv2_w"]), (1, 1),
                                 [(0, 0), (0, 0)], dimension_numbers=dn)
    y = jax.nn.relu(y + tp["conv2_b"][None, :, None, None])
    y = lax.reduce_window(y, -jnp.inf, lax.max, (1, 1, 2, 2), (1, 1, 2, 2), "VALID")
    y = y.reshape(y.shape[0], -1)
    y = jax.nn.relu(_bf16(y) @ _bf16(tp["fc1_w"]).T + tp["fc1_b"])
    y = jax.nn.relu(_bf16(y) @ _bf16(tp["fc2_w"]).T + tp["fc2_b"])
    return _bf16(y) @ _bf16(tp["fc3_w"]).T + tp["fc3_b"]


if __name__ == "__main__":
    key = jax.random.PRNGKey(0)
    pkey, xkey = jax.random.split(key)
    torch_params = init_torch_params(pkey)
    kparams = prepare_params(torch_params)

    # Input implied by the module: 1-channel 32x32 (fc1 expects 16*6*6 after two pools)
    x = jax.random.normal(xkey, (2, 1, 32, 32), dtype=jnp.float32)

    out = jax.block_until_ready(cnn_forward(kparams, x))
    assert out.shape == (2, 10), out.shape

    ref = reference_forward(torch_params, x)
    err = float(jnp.max(jnp.abs(out - ref)))
    assert err < 1e-2, f"max abs error vs reference: {err}"

    print("KERNEL_OK")
</pallas_src>

<mosaic_0001>
module attributes {stable_mosaic.version = 11 : i64} {
  func.func @_conv_relu_pool_kernel(%arg0: i32, %arg1: memref<512x32xbf16, #tpu.memory_space<vmem>>, %arg2: memref<32x6xbf16, #tpu.memory_space<vmem>>, %arg3: memref<1x6xf32, #tpu.memory_space<vmem>>, %arg4: memref<128x6xbf16, #tpu.memory_space<vmem>>) attributes {dimension_semantics = [#tpu.dimension_semantics<parallel>], iteration_bounds = array<i64: 4>, scalar_prefetch = 0 : i64, scratch_operands = 0 : i64, tpu.core_type = #tpu.core_type<tc>, window_params = [{transform_indices = @transform_0, window_bounds = array<i64: 512, 32>}, {pipeline_mode = #tpu.pipeline_mode<synchronous>, transform_indices = @transform_1, window_bounds = array<i64: 32, 6>}, {pipeline_mode = #tpu.pipeline_mode<synchronous>, transform_indices = @transform_2, window_bounds = array<i64: 1, 6>}, {transform_indices = @transform_3, window_bounds = array<i64: 128, 6>}]} {
    %c0 = arith.constant 0 : index
    %c0_0 = arith.constant 0 : index
    %0 = vector.load %arg1[%c0, %c0_0] : memref<512x32xbf16, #tpu.memory_space<vmem>>, vector<512x32xbf16>
    %c0_1 = arith.constant 0 : index
    %c0_2 = arith.constant 0 : index
    %1 = vector.load %arg2[%c0_1, %c0_2] : memref<32x6xbf16, #tpu.memory_space<vmem>>, vector<32x6xbf16>
    %cst = arith.constant dense<0.000000e+00> : vector<512x6xf32>
    %2 = tpu.matmul %0, %1, %cst {dimension_numbers = #tpu.dot_dimension_numbers<[1], [0], [0], [1], [0, 0, 1, 1], [], []>} : vector<512x32xbf16>, vector<32x6xbf16>, vector<512x6xf32> -> vector<512x6xf32>
    %3 = vector.extract_strided_slice %2 {offsets = [0, 0], sizes = [128, 6], strides = [1, 1]} : vector<512x6xf32> to vector<128x6xf32>
    %4 = vector.extract_strided_slice %2 {offsets = [128, 0], sizes = [128, 6], strides = [1, 1]} : vector<512x6xf32> to vector<128x6xf32>
    %5 = arith.maximumf %3, %4 : vector<128x6xf32>
    %6 = vector.extract_strided_slice %2 {offsets = [256, 0], sizes = [128, 6], strides = [1, 1]} : vector<512x6xf32> to vector<128x6xf32>
    %7 = vector.extract_strided_slice %2 {offsets = [384, 0], sizes = [128, 6], strides = [1, 1]} : vector<512x6xf32> to vector<128x6xf32>
    %8 = arith.maximumf %6, %7 : vector<128x6xf32>
    %9 = arith.maximumf %5, %8 : vector<128x6xf32>
    %c0_3 = arith.constant 0 : index
    %c0_4 = arith.constant 0 : index
    %10 = vector.load %arg3[%c0_3, %c0_4] : memref<1x6xf32, #tpu.memory_space<vmem>>, vector<1x6xf32>
    %11 = vector.broadcast %10 : vector<1x6xf32> to vector<128x6xf32>
    %12 = arith.addf %9, %11 : vector<128x6xf32>
    %cst_5 = arith.constant 0.000000e+00 : f32
    %13 = vector.broadcast %cst_5 : f32 to vector<128x6xf32>
    %14 = arith.maximumf %12, %13 : vector<128x6xf32>
    %15 = arith.truncf %14 : vector<128x6xf32> to vector<128x6xbf16>
    %c0_6 = arith.constant 0 : index
    %c0_7 = arith.constant 0 : index
    %16 = vector.load %arg4[%c0_6, %c0_7] : memref<128x6xbf16, #tpu.memory_space<vmem>>, vector<128x6xbf16>
    tpu.vector_store %arg4[%c0_6, %c0_7], %15 {strides = array<i32>} : memref<128x6xbf16, #tpu.memory_space<vmem>>, vector<128x6xbf16>,
    return
  }
  func.func @transform_0(%arg0: i32) -> (i32, i32) {
    %c0_i32 = arith.constant 0 : i32
    %c0_i32_0 = arith.constant 0 : i32
    return %arg0, %c0_i32 : i32, i32
  }
  func.func @transform_1(%arg0: i32) -> (i32, i32) {
    %c0_i32 = arith.constant 0 : i32
    %c0_i32_0 = arith.constant 0 : i32
    %c0_i32_1 = arith.constant 0 : i32
    return %c0_i32, %c0_i32_0 : i32, i32
  }
  func.func @transform_2(%arg0: i32) -> (i32, i32) {
    %c0_i32 = arith.constant 0 : i32
    %c0_i32_0 = arith.constant 0 : i32
    %c0_i32_1 = arith.constant 0 : i32
    return %c0_i32, %c0_i32_0 : i32, i32
  }
  func.func @transform_3(%arg0: i32) -> (i32, i32) {
    %c0_i32 = arith.constant 0 : i32
    %c0_i32_0 = arith.constant 0 : i32
    return %arg0, %c0_i32 : i32, i32
  }
}

module attributes {stable_mosaic.version = 11 : i64} {
  func.func @_conv_relu_pool_kernel(%arg0: i32, %arg1: memref<96x160xbf16, #tpu.memory_space<vmem>>, %arg2: memref<160x16xbf16, #tpu.memory_space<vmem>>, %arg3: memref<1x16xf32, #tpu.memory_space<vmem>>, %arg4: memref<24x16xbf16, #tpu.memory_space<vmem>>) attributes {dimension_semantics = [#tpu.dimension_semantics<parallel>], iteration_bounds = array<i64: 3>, scalar_prefetch = 0 : i64, scratch_operands = 0 : i64, tpu.core_type = #tpu.core_type<tc>, window_params = [{transform_indices = @transform_0, window_bounds = array<i64: 96, 160>}, {pipeline_mode = #tpu.pipeline_mode<synchronous>, transform_indices = @transform_1, window_bounds = array<i64: 160, 16>}, {pipeline_mode = #tpu.pipeline_mode<synchronous>, transform_indices = @transform_2, window_bounds = array<i64: 1, 16>}, {transform_indices = @transform_3, window_bounds = array<i64: 24, 16>}]} {
    %c0 = arith.constant 0 : index
    %c0_0 = arith.constant 0 : index
    %0 = vector.load %arg1[%c0, %c0_0] : memref<96x160xbf16, #tpu.memory_space<vmem>>, vector<96x160xbf16>
    %c0_1 = arith.constant 0 : index
    %c0_2 = arith.constant 0 : index
    %1 = vector.load %arg2[%c0_1, %c0_2] : memref<160x16xbf16, #tpu.memory_space<vmem>>, vector<160x16xbf16>
    %cst = arith.constant dense<0.000000e+00> : vector<96x16xf32>
    %2 = tpu.matmul %0, %1, %cst {dimension_numbers = #tpu.dot_dimension_numbers<[1], [0], [0], [1], [0, 0, 1, 1], [], []>} : vector<96x160xbf16>, vector<160x16xbf16>, vector<96x16xf32> -> vector<96x16xf32>
    %3 = vector.extract_strided_slice %2 {offsets = [0, 0], sizes = [24, 16], strides = [1, 1]} : vector<96x16xf32> to vector<24x16xf32>
    %4 = vector.extract_strided_slice %2 {offsets = [24, 0], sizes = [24, 16], strides = [1, 1]} : vector<96x16xf32> to vector<24x16xf32>
    %5 = arith.maximumf %3, %4 : vector<24x16xf32>
    %6 = vector.extract_strided_slice %2 {offsets = [48, 0], sizes = [24, 16], strides = [1, 1]} : vector<96x16xf32> to vector<24x16xf32>
    %7 = vector.extract_strided_slice %2 {offsets = [72, 0], sizes = [24, 16], strides = [1, 1]} : vector<96x16xf32> to vector<24x16xf32>
    %8 = arith.maximumf %6, %7 : vector<24x16xf32>
    %9 = arith.maximumf %5, %8 : vector<24x16xf32>
    %c0_3 = arith.constant 0 : index
    %c0_4 = arith.constant 0 : index
    %10 = vector.load %arg3[%c0_3, %c0_4] : memref<1x16xf32, #tpu.memory_space<vmem>>, vector<1x16xf32>
    %11 = vector.broadcast %10 : vector<1x16xf32> to vector<24x16xf32>
    %12 = arith.addf %9, %11 : vector<24x16xf32>
    %cst_5 = arith.constant 0.000000e+00 : f32
    %13 = vector.broadcast %cst_5 : f32 to vector<24x16xf32>
    %14 = arith.maximumf %12, %13 : vector<24x16xf32>
    %15 = arith.truncf %14 : vector<24x16xf32> to vector<24x16xbf16>
    %c0_6 = arith.constant 0 : index
    %c0_7 = arith.constant 0 : index
    %16 = vector.load %arg4[%c0_6, %c0_7] : memref<24x16xbf16, #tpu.memory_space<vmem>>, vector<24x16xbf16>
    tpu.vector_store %arg4[%c0_6, %c0_7], %15 {strides = array<i32>} : memref<24x16xbf16, #tpu.memory_space<vmem>>, vector<24x16xbf16>,
    return
  }
  func.func @transform_0(%arg0: i32) -> (i32, i32) {
    %c0_i32 = arith.constant 0 : i32
    %c0_i32_0 = arith.constant 0 : i32
    return %arg0, %c0_i32 : i32, i32
  }
  func.func @transform_1(%arg0: i32) -> (i32, i32) {
    %c0_i32 = arith.constant 0 : i32
    %c0_i32_0 = arith.constant 0 : i32
    %c0_i32_1 = arith.constant 0 : i32
    return %c0_i32, %c0_i32_0 : i32, i32
  }
  func.func @transform_2(%arg0: i32) -> (i32, i32) {
    %c0_i32 = arith.constant 0 : i32
    %c0_i32_0 = arith.constant 0 : i32
    %c0_i32_1 = arith.constant 0 : i32
    return %c0_i32, %c0_i32_0 : i32, i32
  }
  func.func @transform_3(%arg0: i32) -> (i32, i32) {
    %c0_i32 = arith.constant 0 : i32
    %c0_i32_0 = arith.constant 0 : i32
    return %arg0, %c0_i32 : i32, i32
  }
}

module attributes {stable_mosaic.version = 11 : i64} {
  func.func @_fc_fused_kernel(%arg0: i32, %arg1: memref<8x576xbf16, #tpu.memory_space<vmem>>, %arg2: memref<576x120xbf16, #tpu.memory_space<vmem>>, %arg3: memref<1x120xf32, #tpu.memory_space<vmem>>, %arg4: memref<120x84xbf16, #tpu.memory_space<vmem>>, %arg5: memref<1x84xf32, #tpu.memory_space<vmem>>, %arg6: memref<84x10xbf16, #tpu.memory_space<vmem>>, %arg7: memref<1x10xf32, #tpu.memory_space<vmem>>, %arg8: memref<8x10xf32, #tpu.memory_space<vmem>>) attributes {dimension_semantics = [#tpu.dimension_semantics<parallel>], iteration_bounds = array<i64: 1>, scalar_prefetch = 0 : i64, scratch_operands = 0 : i64, tpu.core_type = #tpu.core_type<tc>, window_params = [{transform_indices = @transform_0, window_bounds = array<i64: 8, 576>}, {pipeline_mode = #tpu.pipeline_mode<synchronous>, transform_indices = @transform_1, window_bounds = array<i64: 576, 120>}, {pipeline_mode = #tpu.pipeline_mode<synchronous>, transform_indices = @transform_2, window_bounds = array<i64: 1, 120>}, {pipeline_mode = #tpu.pipeline_mode<synchronous>, transform_indices = @transform_3, window_bounds = array<i64: 120, 84>}, {pipeline_mode = #tpu.pipeline_mode<synchronous>, transform_indices = @transform_4, window_bounds = array<i64: 1, 84>}, {pipeline_mode = #tpu.pipeline_mode<synchronous>, transform_indices = @transform_5, window_bounds = array<i64: 84, 10>}, {pipeline_mode = #tpu.pipeline_mode<synchronous>, transform_indices = @transform_6, window_bounds = array<i64: 1, 10>}, {transform_indices = @transform_7, window_bounds = array<i64: 8, 10>}]} {
    %c0 = arith.constant 0 : index
    %c0_0 = arith.constant 0 : index
    %0 = vector.load %arg1[%c0, %c0_0] : memref<8x576xbf16, #tpu.memory_space<vmem>>, vector<8x576xbf16>
    %c0_1 = arith.constant 0 : index
    %c0_2 = arith.constant 0 : index
    %1 = vector.load %arg2[%c0_1, %c0_2] : memref<576x120xbf16, #tpu.memory_space<vmem>>, vector<576x120xbf16>
    %cst = arith.constant dense<0.000000e+00> : vector<8x120xf32>
    %2 = tpu.matmul %0, %1, %cst {dimension_numbers = #tpu.dot_dimension_numbers<[1], [0], [0], [1], [0, 0, 1, 1], [], []>} : vector<8x576xbf16>, vector<576x120xbf16>, vector<8x120xf32> -> vector<8x120xf32>
    %c0_3 = arith.constant 0 : index
    %c0_4 = arith.constant 0 : index
    %3 = vector.load %arg3[%c0_3, %c0_4] : memref<1x120xf32, #tpu.memory_space<vmem>>, vector<1x120xf32>
    %4 = vector.broadcast %3 : vector<1x120xf32> to vector<8x120xf32>
    %5 = arith.addf %2, %4 : vector<8x120xf32>
    %cst_5 = arith.constant 0.000000e+00 : f32
    %6 = vector.broadcast %cst_5 : f32 to vector<8x120xf32>
    %7 = arith.maximumf %5, %6 : vector<8x120xf32>
    %8 = arith.truncf %7 : vector<8x120xf32> to vector<8x120xbf16>
    %c0_6 = arith.constant 0 : index
    %c0_7 = arith.constant 0 : index
    %9 = vector.load %arg4[%c0_6, %c0_7] : memref<120x84xbf16, #tpu.memory_space<vmem>>, vector<120x84xbf16>
    %cst_8 = arith.constant dense<0.000000e+00> : vector<8x84xf32>
    %10 = tpu.matmul %8, %9, %cst_8 {dimension_numbers = #tpu.dot_dimension_numbers<[1], [0], [0], [1], [0, 0, 1, 1], [], []>} : vector<8x120xbf16>, vector<120x84xbf16>, vector<8x84xf32> -> vector<8x84xf32>
    %c0_9 = arith.constant 0 : index
    %c0_10 = arith.constant 0 : index
    %11 = vector.load %arg5[%c0_9, %c0_10] : memref<1x84xf32, #tpu.memory_space<vmem>>, vector<1x84xf32>
    %12 = vector.broadcast %11 : vector<1x84xf32> to vector<8x84xf32>
    %13 = arith.addf %10, %12 : vector<8x84xf32>
    %cst_11 = arith.constant 0.000000e+00 : f32
    %14 = vector.broadcast %cst_11 : f32 to vector<8x84xf32>
    %15 = arith.maximumf %13, %14 : vector<8x84xf32>
    %16 = arith.truncf %15 : vector<8x84xf32> to vector<8x84xbf16>
    %c0_12 = arith.constant 0 : index
    %c0_13 = arith.constant 0 : index
    %17 = vector.load %arg6[%c0_12, %c0_13] : memref<84x10xbf16, #tpu.memory_space<vmem>>, vector<84x10xbf16>
    %cst_14 = arith.constant dense<0.000000e+00> : vector<8x10xf32>
    %18 = tpu.matmul %16, %17, %cst_14 {dimension_numbers = #tpu.dot_dimension_numbers<[1], [0], [0], [1], [0, 0, 1, 1], [], []>} : vector<8x84xbf16>, vector<84x10xbf16>, vector<8x10xf32> -> vector<8x10xf32>
    %c0_15 = arith.constant 0 : index
    %c0_16 = arith.constant 0 : index
    %19 = vector.load %arg7[%c0_15, %c0_16] : memref<1x10xf32, #tpu.memory_space<vmem>>, vector<1x10xf32>
    %20 = vector.broadcast %19 : vector<1x10xf32> to vector<8x10xf32>
    %21 = arith.addf %18, %20 : vector<8x10xf32>
    %c0_17 = arith.constant 0 : index
    %c0_18 = arith.constant 0 : index
    %22 = vector.load %arg8[%c0_17, %c0_18] : memref<8x10xf32, #tpu.memory_space<vmem>>, vector<8x10xf32>
    tpu.vector_store %arg8[%c0_17, %c0_18], %21 {strides = array<i32>} : memref<8x10xf32, #tpu.memory_space<vmem>>, vector<8x10xf32>,
    return
  }
  func.func @transform_0(%arg0: i32) -> (i32, i32) {
    %c0_i32 = arith.constant 0 : i32
    %c0_i32_0 = arith.constant 0 : i32
    return %arg0, %c0_i32 : i32, i32
  }
  func.func @transform_1(%arg0: i32) -> (i32, i32) {
    %c0_i32 = arith.constant 0 : i32
    %c0_i32_0 = arith.constant 0 : i32
    %c0_i32_1 = arith.constant 0 : i32
    return %c0_i32, %c0_i32_0 : i32, i32
  }
  func.func @transform_2(%arg0: i32) -> (i32, i32) {
    %c0_i32 = arith.constant 0 : i32
    %c0_i32_0 = arith.constant 0 : i32
    %c0_i32_1 = arith.constant 0 : i32
    return %c0_i32, %c0_i32_0 : i32, i32
  }
  func.func @transform_3(%arg0: i32) -> (i32, i32) {
    %c0_i32 = arith.constant 0 : i32
    %c0_i32_0 = arith.constant 0 : i32
    %c0_i32_1 = arith.constant 0 : i32
    return %c0_i32, %c0_i32_0 : i32, i32
  }
  func.func @transform_4(%arg0: i32) -> (i32, i32) {
    %c0_i32 = arith.constant 0 : i32
    %c0_i32_0 = arith.constant 0 : i32
    %c0_i32_1 = arith.constant 0 : i32
    return %c0_i32, %c0_i32_0 : i32, i32
  }
  func.func @transform_5(%arg0: i32) -> (i32, i32) {
    %c0_i32 = arith.constant 0 : i32
    %c0_i32_0 = arith.constant 0 : i32
    %c0_i32_1 = arith.constant 0 : i32
    return %c0_i32, %c0_i32_0 : i32, i32
  }
  func.func @transform_6(%arg0: i32) -> (i32, i32) {
    %c0_i32 = arith.constant 0 : i32
    %c0_i32_0 = arith.constant 0 : i32
    %c0_i32_1 = arith.constant 0 : i32
    return %c0_i32, %c0_i32_0 : i32, i32
  }
  func.func @transform_7(%arg0: i32) -> (i32, i32) {
    %c0_i32 = arith.constant 0 : i32
    %c0_i32_0 = arith.constant 0 : i32
    return %arg0, %c0_i32 : i32, i32
  }
}

</mosaic_0001>

<bundles_post_ra>
// kernel: cnn_forward.3
= control target key start
LH: loop header
LB: loop body
LE: loop exit
PB: predicated region body
PF: predicated region fallthrough
CT: control target
= control target key end

     0   :  { %s1110_s12 = smov 0   ;;  %s1258_s0 = inlined_call_operand.vmem [shape: bf16[2048,32], index: 0, kind: input, shape index: {}]   ;;  %s1259_s1 = inlined_call_operand.vmem [shape: bf16[32,6], index: 1, kind: input, shape index: {}]   ;;  %s1260_s2 = inlined_call_operand.vmem [shape: f32[1,6], index: 2, kind: input, shape index: {}]   ;;  %s1261_s3 = inlined_call_operand.vmem [shape: bf16[512,6], index: 3, kind: output, shape index: {}]  }
   0x1 LB: > { %s854_s13 = sadd.s32 4294967295, %s1088_s12   ;;  %p858_p0 = scmp.ge.s32.totalorder %s1088_s12, 1  ;;  %s1088_s12 = sphi %s1110_s12, %s13_s12  }
   0x2   : > { %p138_p1 = scmp.lt.s32.totalorder %s1088_s12, 5 }
   0x4   : > { %p139_p2 = pnand %p858_p0, %p138_p1 }
   0x5   : > { %s859_s16 = sshll.u32 (!%p139_p2), %s854_s13, 6  ;;  %s861_s23 = sshll.u32 (!%p139_p2), %s854_s13, 4 }
   0x6   : > { %142 = sbr.rel (%p139_p2) target bundleno = 283 (0x11b), region = 32  ;;  %p163_p3 = scmp.lt.s32.totalorder (!%p139_p2), %s859_s16, 255 }
   0x7   : > { %p169_p4 = scmp.lt.s32.totalorder (!%p139_p2), %s861_s23, 63 }
   0xb   : > { %v1066_v0 = vld [vmem:[%s1259_s1 + $0x8] sm:$0xff]  ;;  %v1065_v1 = vld [vmem:[%s1259_s1] sm:$0xff]  ;;  %s1263_s16 = smov (!%p163_p3, %s859_s16), 255  ;;  %vm415_vm0 = vcmask 261120   ;;  %s1265_s23 = smov (!%p169_p4, %s861_s23), 63  ;;  %vm781_vm1 = vcmask 44032  }
   0xc   : > { %518 = vmatpush.bf16.msra.mxu0 %v1066_v0  ;;  %1067 = vmatpush.bf16.msra.mxu1 %v1066_v0  ;;  %s860_s19 = sshll.u32 %s1263_s16, 2  ;;  %v1200_v40 = vld [vmem:[%s1260_s2] ss:$0 sm:$0xff]  ;;  %s862_s26 = sshll.u32 %s1265_s23, 2 }
   0xd   : > { %1068 = vmatpush.bf16.msra.mxu2 %v1066_v0  ;;  %1069 = vmatpush.bf16.msra.mxu3 %v1066_v0  ;;  %s1129_s22 = scalar_lea.vmem %s1258_s0, %s860_s19  ;;  %s1206_s29 = scalar_lea.vmem %s1261_s3, %s862_s26 }
   0xe   : > { %v1033_v2 = vld [vmem:[%s1129_s22] sm:$0xff]  ;;  %v1034_v6 = vld [vmem:[%s1129_s22 + $0x8] sm:$0xff]  ;;  %v1035_v10 = vld [vmem:[%s1129_s22 + $0x10] sm:$0xff] }
   0xf   : > { %v1041_v3 = vld [vmem:[%s1129_s22 + $0x40] sm:$0xff]  ;;  %v1042_v7 = vld [vmem:[%s1129_s22 + $0x48] sm:$0xff]  ;;  %v1043_v11 = vld [vmem:[%s1129_s22 + $0x50] sm:$0xff] }
  0x10   : > { %519 = vmatpush.bf16.msra.mxu0 %v1065_v1  ;;  %1070 = vmatpush.bf16.msra.mxu1 %v1065_v1  ;;  %v1049_v4 = vld [vmem:[%s1129_s22 + $0x80] sm:$0xff]  ;;  %v1050_v8 = vld [vmem:[%s1129_s22 + $0x88] sm:$0xff]  ;;  %v1051_v12 = vld [vmem:[%s1129_s22 + $0x90] sm:$0xff] }
  0x11   : > { %1071 = vmatpush.bf16.msra.mxu2 %v1065_v1  ;;  %1072 = vmatpush.bf16.msra.mxu3 %v1065_v1  ;;  %v1057_v5 = vld [vmem:[%s1129_s22 + $0xc0] sm:$0xff]  ;;  %v1058_v9 = vld [vmem:[%s1129_s22 + $0xc8] sm:$0xff]  ;;  %v1059_v13 = vld [vmem:[%s1129_s22 + $0xd0] sm:$0xff] }
  0x12   : > { %v1036_v14 = vld [vmem:[%s1129_s22 + $0x18] sm:$0xff]  ;;  %v1037_v18 = vld [vmem:[%s1129_s22 + $0x20] sm:$0xff]  ;;  %v1038_v22 = vld [vmem:[%s1129_s22 + $0x28] sm:$0xff] }
  0x13   : > { %999 = vmatmul.msk.bf16.vlgmr.msra.gmra.mxu0 %vm415_vm0, %v1033_v2  ;;  %1007 = vmatmul.msk.bf16.vlgmr.msra.gmra.mxu1 %vm415_vm0, %v1041_v3  ;;  %v1044_v15 = vld [vmem:[%s1129_s22 + $0x58] sm:$0xff]  ;;  %v1045_v19 = vld [vmem:[%s1129_s22 + $0x60] sm:$0xff]  ;;  %v1046_v23 = vld [vmem:[%s1129_s22 + $0x68] sm:$0xff] }
  0x14   : > { %1015 = vmatmul.msk.bf16.vlgmr.msra.gmra.mxu2 %vm415_vm0, %v1049_v4  ;;  %1023 = vmatmul.msk.bf16.vlgmr.msra.gmra.mxu3 %vm415_vm0, %v1057_v5  ;;  %v1052_v16 = vld [vmem:[%s1129_s22 + $0x98] sm:$0xff]  ;;  %v1053_v20 = vld [vmem:[%s1129_s22 + $0xa0] sm:$0xff]  ;;  %v1054_v24 = vld [vmem:[%s1129_s22 + $0xa8] sm:$0xff] }
  0x15   : > { %v1060_v17 = vld [vmem:[%s1129_s22 + $0xd8] sm:$0xff]  ;;  %v1061_v21 = vld [vmem:[%s1129_s22 + $0xe0] sm:$0xff]  ;;  %v1062_v25 = vld [vmem:[%s1129_s22 + $0xe8] sm:$0xff] }
  0x16   : > { %v1039_v26 = vld [vmem:[%s1129_s22 + $0x30] sm:$0xff]  ;;  %v1040_v30 = vld [vmem:[%s1129_s22 + $0x38] sm:$0xff] }
  0x17   : > { %v1047_v27 = vld [vmem:[%s1129_s22 + $0x70] sm:$0xff]  ;;  %v1048_v31 = vld [vmem:[%s1129_s22 + $0x78] sm:$0xff] }
  0x18   : > { %v1055_v28 = vld [vmem:[%s1129_s22 + $0xb0] sm:$0xff]  ;;  %v1056_v32 = vld [vmem:[%s1129_s22 + $0xb8] sm:$0xff] }
  0x19   : > { %v1063_v29 = vld [vmem:[%s1129_s22 + $0xf0] sm:$0xff]  ;;  %v1064_v33 = vld [vmem:[%s1129_s22 + $0xf8] sm:$0xff] }
  0x23   : > { %1000 = vmatmul.msk.bf16.gmra.mxu0 %vm415_vm0, %v1034_v6  ;;  %1008 = vmatmul.msk.bf16.gmra.mxu1 %vm415_vm0, %v1042_v7 }
  0x24   : > { %1016 = vmatmul.msk.bf16.gmra.mxu2 %vm415_vm0, %v1050_v8  ;;  %1024 = vmatmul.msk.bf16.gmra.mxu3 %vm415_vm0, %v1058_v9 }
  0x33   : > { %1001 = vmatmul.msk.bf16.gmra.mxu0 %vm415_vm0, %v1035_v10  ;;  %1009 = vmatmul.msk.bf16.gmra.mxu1 %vm415_vm0, %v1043_v11 }
  0x34   : > { %1017 = vmatmul.msk.bf16.gmra.mxu2 %vm415_vm0, %v1051_v12  ;;  %1025 = vmatmul.msk.bf16.gmra.mxu3 %vm415_vm0, %v1059_v13 }
  0x43   : > { %1002 = vmatmul.msk.bf16.gmra.mxu0 %vm415_vm0, %v1036_v14  ;;  %1010 = vmatmul.msk.bf16.gmra.mxu1 %vm415_vm0, %v1044_v15 }
  0x44   : > { %1018 = vmatmul.msk.bf16.gmra.mxu2 %vm415_vm0, %v1052_v16  ;;  %1026 = vmatmul.msk.bf16.gmra.mxu3 %vm415_vm0, %v1060_v17 }
  0x53   : > { %1003 = vmatmul.msk.bf16.gmra.mxu0 %vm415_vm0, %v1037_v18  ;;  %1011 = vmatmul.msk.bf16.gmra.mxu1 %vm415_vm0, %v1045_v19 }
  0x54   : > { %1019 = vmatmul.msk.bf16.gmra.mxu2 %vm415_vm0, %v1053_v20  ;;  %1027 = vmatmul.msk.bf16.gmra.mxu3 %vm415_vm0, %v1061_v21 }
  0x63   : > { %1004 = vmatmul.msk.bf16.gmra.mxu0 %vm415_vm0, %v1038_v22  ;;  %1012 = vmatmul.msk.bf16.gmra.mxu1 %vm415_vm0, %v1046_v23 }
  0x64   : > { %1020 = vmatmul.msk.bf16.gmra.mxu2 %vm415_vm0, %v1054_v24  ;;  %1028 = vmatmul.msk.bf16.gmra.mxu3 %vm415_vm0, %v1062_v25 }
  0x73   : > { %1005 = vmatmul.msk.bf16.gmra.mxu0 %vm415_vm0, %v1039_v26  ;;  %1013 = vmatmul.msk.bf16.gmra.mxu1 %vm415_vm0, %v1047_v27 }
  0x74   : > { %1021 = vmatmul.msk.bf16.gmra.mxu2 %vm415_vm0, %v1055_v28  ;;  %1029 = vmatmul.msk.bf16.gmra.mxu3 %vm415_vm0, %v1063_v29 }
  0x83   : > { %1006 = vmatmul.msk.bf16.gmra.mxu0 %vm415_vm0, %v1040_v30  ;;  %1014 = vmatmul.msk.bf16.gmra.mxu1 %vm415_vm0, %v1048_v31 }
  0x84   : > { %1022 = vmatmul.msk.bf16.gmra.mxu2 %vm415_vm0, %v1056_v32  ;;  %1030 = vmatmul.msk.bf16.gmra.mxu3 %vm415_vm0, %v1064_v33 }
  0x90   : > { %v521_v34 = vpop.f32.mrf.mxu0  ;;  %v561_v35 = vpop.f32.mrf.mxu1 }
  0x91   : > { %v681_v36 = vmax.f32 %v521_v34, %v561_v35 }
  0x97   : > { %v601_v37 = vpop.f32.mrf.mxu2  ;;  %v641_v38 = vpop.f32.mrf.mxu3 }
  0x98   : > { %v697_v39 = vmax.f32 %v601_v37, %v641_v38  ;;  %v523_v41 = vpop.f32.mrf.mxu0  ;;  %v563_v42 = vpop.f32.mrf.mxu1 }
  0x99   : > { %v682_v49 = vmax.f32 %v523_v41, %v563_v42 }
  0x9a   : > { %v713_v43 = vmax.f32 %v681_v36, %v697_v39 }
  0x9c   : > { %v733_v44 = vadd.f32 %v1200_v40, %v713_v43 }
  0x9e   : > { %v749_v45 = vmax.f32 %v733_v44, 0.0 }
  0x9f   : > { %v603_v46 = vpop.f32.mrf.mxu2  ;;  %v643_v47 = vpop.f32.mrf.mxu3 }
  0xa0   : > { %v765_v48 = vpack.c.bf16 %v749_v45, %v749_v45  ;;  %v698_v50 = vmax.f32 %v603_v46, %v643_v47  ;;  %v526_v51 = vpop.f32.mrf.mxu0  ;;  %v566_v52 = vpop.f32.mrf.mxu1 }
  0xa1   : > { %v683_v56 = vmax.f32 %v526_v51, %v566_v52 }
  0xa2   : > { %782 = vst.msk [vmem:[%s1206_s29] sm:$0xf] %vm781_vm1, %v765_v48  ;;  %v714_v53 = vmax.f32 %v682_v49, %v698_v50 }
  0xa4   : > { %v734_v54 = vadd.f32 %v1200_v40, %v714_v53 }
  0xa6   : > { %v750_v55 = vmax.f32 %v734_v54, 0.0 }
  0xa7   : > { %v606_v57 = vpop.f32.mrf.mxu2  ;;  %v646_v58 = vpop.f32.mrf.mxu3 }
  0xa8   : > { %v766_v59 = vpack.c.bf16 %v750_v55, %v750_v55  ;;  %v699_v60 = vmax.f32 %v606_v57, %v646_v58  ;;  %v528_v61 = vpop.f32.mrf.mxu0  ;;  %v568_v62 = vpop.f32.mrf.mxu1 }
  0xa9   : > { %v684_v5 = vmax.f32 %v528_v61, %v568_v62 }
  0xaa   : > { %783 = vst.msk [vmem:[%s1206_s29 + $0x4] sm:$0xf] %vm781_vm1, %v766_v59  ;;  %v715_v63 = vmax.f32 %v683_v56, %v699_v60 }
  0xac   : > { %v735_v0 = vadd.f32 %v1200_v40, %v715_v63 }
  0xae   : > { %v751_v1 = vmax.f32 %v735_v0, 0.0 }
  0xaf   : > { %v608_v2 = vpop.f32.mrf.mxu2  ;;  %v648_v3 = vpop.f32.mrf.mxu3 }
  0xb0   : > { %v767_v4 = vpack.c.bf16 %v751_v1, %v751_v1  ;;  %v700_v6 = vmax.f32 %v608_v2, %v648_v3  ;;  %v531_v7 = vpop.f32.mrf.mxu0  ;;  %v571_v8 = vpop.f32.mrf.mxu1 }
  0xb1   : > { %v685_v12 = vmax.f32 %v531_v7, %v571_v8 }
  0xb2   : > { %784 = vst.msk [vmem:[%s1206_s29 + $0x8] sm:$0xf] %vm781_vm1, %v767_v4  ;;  %v716_v9 = vmax.f32 %v684_v5, %v700_v6 }
  0xb4   : > { %v736_v10 = vadd.f32 %v1200_v40, %v716_v9 }
  0xb6   : > { %v752_v11 = vmax.f32 %v736_v10, 0.0 }
  0xb7   : > { %v611_v13 = vpop.f32.mrf.mxu2  ;;  %v651_v14 = vpop.f32.mrf.mxu3 }
  0xb8   : > { %v768_v15 = vpack.c.bf16 %v752_v11, %v752_v11  ;;  %v701_v16 = vmax.f32 %v611_v13, %v651_v14  ;;  %v533_v17 = vpop.f32.mrf.mxu0  ;;  %v573_v18 = vpop.f32.mrf.mxu1 }
  0xb9   : > { %v686_v25 = vmax.f32 %v533_v17, %v573_v18 }
  0xba   : > { %785 = vst.msk [vmem:[%s1206_s29 + $0xc] sm:$0xf] %vm781_vm1, %v768_v15  ;;  %v717_v19 = vmax.f32 %v685_v12, %v701_v16 }
  0xbc   : > { %v737_v20 = vadd.f32 %v1200_v40, %v717_v19 }
  0xbe   : > { %v753_v21 = vmax.f32 %v737_v20, 0.0 }
  0xbf   : > { %v613_v22 = vpop.f32.mrf.mxu2  ;;  %v653_v23 = vpop.f32.mrf.mxu3 }
  0xc0   : > { %v769_v24 = vpack.c.bf16 %v753_v21, %v753_v21  ;;  %v702_v26 = vmax.f32 %v613_v22, %v653_v23  ;;  %v536_v27 = vpop.f32.mrf.mxu0  ;;  %v576_v28 = vpop.f32.mrf.mxu1 }
  0xc1   : > { %v687_v32 = vmax.f32 %v536_v27, %v576_v28 }
  0xc2   : > { %786 = vst.msk [vmem:[%s1206_s29 + $0x10] sm:$0xf] %vm781_vm1, %v769_v24  ;;  %v718_v29 = vmax.f32 %v686_v25, %v702_v26 }
  0xc4   : > { %v738_v30 = vadd.f32 %v1200_v40, %v718_v29 }
  0xc6   : > { %v754_v31 = vmax.f32 %v738_v30, 0.0 }
  0xc7   : > { %v616_v33 = vpop.f32.mrf.mxu2  ;;  %v656_v34 = vpop.f32.mrf.mxu3 }
  0xc8   : > { %v770_v35 = vpack.c.bf16 %v754_v31, %v754_v31  ;;  %v703_v36 = vmax.f32 %v616_v33, %v656_v34  ;;  %v538_v37 = vpop.f32.mrf.mxu0  ;;  %v578_v38 = vpop.f32.mrf.mxu1 }
  0xc9   : > { %v688_v46 = vmax.f32 %v538_v37, %v578_v38 }
  0xca   : > { %787 = vst.msk [vmem:[%s1206_s29 + $0x14] sm:$0xf] %vm781_vm1, %v770_v35  ;;  %v719_v39 = vmax.f32 %v687_v32, %v703_v36 }
  0xcc   : > { %v739_v41 = vadd.f32 %v1200_v40, %v719_v39 }
  0xce   : > { %v755_v42 = vmax.f32 %v739_v41, 0.0 }
  0xcf   : > { %v618_v43 = vpop.f32.mrf.mxu2  ;;  %v658_v44 = vpop.f32.mrf.mxu3 }
  0xd0   : > { %v771_v45 = vpack.c.bf16 %v755_v42, %v755_v42  ;;  %v704_v47 = vmax.f32 %v618_v43, %v658_v44  ;;  %v541_v48 = vpop.f32.mrf.mxu0  ;;  %v581_v49 = vpop.f32.mrf.mxu1 }
  0xd1   : > { %v689_v53 = vmax.f32 %v541_v48, %v581_v49 }
  0xd2   : > { %788 = vst.msk [vmem:[%s1206_s29 + $0x18] sm:$0xf] %vm781_vm1, %v771_v45  ;;  %v720_v50 = vmax.f32 %v688_v46, %v704_v47 }
  0xd4   : > { %v740_v51 = vadd.f32 %v1200_v40, %v720_v50 }
  0xd6   : > { %v756_v52 = vmax.f32 %v740_v51, 0.0 }
  0xd7   : > { %v621_v54 = vpop.f32.mrf.mxu2  ;;  %v661_v55 = vpop.f32.mrf.mxu3 }
  0xd8   : > { %v772_v56 = vpack.c.bf16 %v756_v52, %v756_v52  ;;  %v705_v57 = vmax.f32 %v621_v54, %v661_v55  ;;  %v543_v58 = vpop.f32.mrf.mxu0  ;;  %v583_v59 = vpop.f32.mrf.mxu1 }
  0xd9   : > { %v690_v2 = vmax.f32 %v543_v58, %v583_v59 }
  0xda   : > { %789 = vst.msk [vmem:[%s1206_s29 + $0x1c] sm:$0xf] %vm781_vm1, %v772_v56  ;;  %v721_v60 = vmax.f32 %v689_v53, %v705_v57 }
  0xdc   : > { %v741_v61 = vadd.f32 %v1200_v40, %v721_v60 }
  0xde   : > { %v757_v62 = vmax.f32 %v741_v61, 0.0 }
  0xdf   : > { %v623_v63 = vpop.f32.mrf.mxu2  ;;  %v663_v0 = vpop.f32.mrf.mxu3 }
  0xe0   : > { %v773_v1 = vpack.c.bf16 %v757_v62, %v757_v62  ;;  %v706_v3 = vmax.f32 %v623_v63, %v663_v0  ;;  %v546_v4 = vpop.f32.mrf.mxu0  ;;  %v586_v5 = vpop.f32.mrf.mxu1 }
  0xe1   : > { %v691_v9 = vmax.f32 %v546_v4, %v586_v5 }
  0xe2   : > { %790 = vst.msk [vmem:[%s1206_s29 + $0x20] sm:$0xf] %vm781_vm1, %v773_v1  ;;  %v722_v6 = vmax.f32 %v690_v2, %v706_v3 }
  0xe4   : > { %v742_v7 = vadd.f32 %v1200_v40, %v722_v6 }
  0xe6   : > { %v758_v8 = vmax.f32 %v742_v7, 0.0 }
  0xe7   : > { %v626_v10 = vpop.f32.mrf.mxu2  ;;  %v666_v11 = vpop.f32.mrf.mxu3 }
  0xe8   : > { %v774_v12 = vpack.c.bf16 %v758_v8, %v758_v8  ;;  %v707_v13 = vmax.f32 %v626_v10, %v666_v11  ;;  %v548_v14 = vpop.f32.mrf.mxu0  ;;  %v588_v15 = vpop.f32.mrf.mxu1 }
  0xe9   : > { %v692_v22 = vmax.f32 %v548_v14, %v588_v15 }
  0xea   : > { %791 = vst.msk [vmem:[%s1206_s29 + $0x24] sm:$0xf] %vm781_vm1, %v774_v12  ;;  %v723_v16 = vmax.f32 %v691_v9, %v707_v13 }
  0xec   : > { %v743_v17 = vadd.f32 %v1200_v40, %v723_v16 }
  0xee   : > { %v759_v18 = vmax.f32 %v743_v17, 0.0 }
  0xef   : > { %v628_v19 = vpop.f32.mrf.mxu2  ;;  %v668_v20 = vpop.f32.mrf.mxu3 }
  0xf0   : > { %v775_v21 = vpack.c.bf16 %v759_v18, %v759_v18  ;;  %v708_v23 = vmax.f32 %v628_v19, %v668_v20  ;;  %v551_v24 = vpop.f32.mrf.mxu0  ;;  %v591_v25 = vpop.f32.mrf.mxu1 }
  0xf1   : > { %v693_v29 = vmax.f32 %v551_v24, %v591_v25 }
  0xf2   : > { %792 = vst.msk [vmem:[%s1206_s29 + $0x28] sm:$0xf] %vm781_vm1, %v775_v21  ;;  %v724_v26 = vmax.f32 %v692_v22, %v708_v23 }
  0xf4   : > { %v744_v27 = vadd.f32 %v1200_v40, %v724_v26 }
  0xf6   : > { %v760_v28 = vmax.f32 %v744_v27, 0.0 }
  0xf7   : > { %v631_v30 = vpop.f32.mrf.mxu2  ;;  %v671_v31 = vpop.f32.mrf.mxu3 }
  0xf8   : > { %v776_v32 = vpack.c.bf16 %v760_v28, %v760_v28  ;;  %v709_v33 = vmax.f32 %v631_v30, %v671_v31  ;;  %v553_v34 = vpop.f32.mrf.mxu0  ;;  %v593_v35 = vpop.f32.mrf.mxu1 }
  0xf9   : > { %v694_v43 = vmax.f32 %v553_v34, %v593_v35 }
  0xfa   : > { %793 = vst.msk [vmem:[%s1206_s29 + $0x2c] sm:$0xf] %vm781_vm1, %v776_v32  ;;  %v725_v36 = vmax.f32 %v693_v29, %v709_v33 }
  0xfc   : > { %v745_v37 = vadd.f32 %v1200_v40, %v725_v36 }
  0xfe   : > { %v761_v38 = vmax.f32 %v745_v37, 0.0 }
  0xff   : > { %v633_v39 = vpop.f32.mrf.mxu2  ;;  %v673_v41 = vpop.f32.mrf.mxu3 }
 0x100   : > { %v777_v42 = vpack.c.bf16 %v761_v38, %v761_v38  ;;  %v710_v44 = vmax.f32 %v633_v39, %v673_v41  ;;  %v556_v46 = vpop.f32.mrf.mxu0  ;;  %v596_v47 = vpop.f32.mrf.mxu1 }
 0x101   : > { %v695_v50 = vmax.f32 %v556_v46, %v596_v47 }
 0x102   : > { %794 = vst.msk [vmem:[%s1206_s29 + $0x30] sm:$0xf] %vm781_vm1, %v777_v42  ;;  %v726_v45 = vmax.f32 %v694_v43, %v710_v44 }
 0x104   : > { %v746_v48 = vadd.f32 %v1200_v40, %v726_v45 }
 0x106   : > { %v762_v49 = vmax.f32 %v746_v48, 0.0 }
 0x107   : > { %v636_v51 = vpop.f32.mrf.mxu2  ;;  %v676_v52 = vpop.f32.mrf.mxu3 }
 0x108   : > { %v778_v53 = vpack.c.bf16 %v762_v49, %v762_v49  ;;  %v711_v54 = vmax.f32 %v636_v51, %v676_v52  ;;  %v558_v57 = vpop.f32.mrf.mxu0  ;;  %v598_v58 = vpop.f32.mrf.mxu1 }
 0x109   : > { %v696_v63 = vmax.f32 %v558_v57, %v598_v58 }
 0x10a   : > { %795 = vst.msk [vmem:[%s1206_s29 + $0x34] sm:$0xf] %vm781_vm1, %v778_v53  ;;  %v727_v55 = vmax.f32 %v695_v50, %v711_v54 }
 0x10c   : > { %v747_v56 = vadd.f32 %v1200_v40, %v727_v55 }
 0x10e   : > { %v763_v59 = vmax.f32 %v747_v56, 0.0 }
 0x10f   : > { %v638_v60 = vpop.f32.mrf.mxu2  ;;  %v678_v61 = vpop.f32.mrf.mxu3 }
 0x110   : > { %v779_v62 = vpack.c.bf16 %v763_v59, %v763_v59  ;;  %v712_v0 = vmax.f32 %v638_v60, %v678_v61 }
 0x112   : > { %796 = vst.msk [vmem:[%s1206_s29 + $0x38] sm:$0xf] %vm781_vm1, %v779_v62  ;;  %v728_v1 = vmax.f32 %v696_v63, %v712_v0 }
 0x114   : > { %v748_v2 = vadd.f32 %v1200_v40, %v728_v1 }
 0x116   : > { %v764_v3 = vmax.f32 %v748_v2, 0.0 }
 0x118   : > { %v780_v4 = vpack.c.bf16 %v764_v3, %v764_v3 }
 0x11a   : > { %797 = vst.msk [vmem:[%s1206_s29 + $0x3c] sm:$0xf] %vm781_vm1, %v780_v4 }
 0x11b PF: > { %s13_s12 = sadd.s32 1, %s1088_s12  }
 0x11c   : > { %p10_p5 = scmp.ge.s32.totalorder %s13_s12, 6  }
 0x11e   :  { %12 = sbr.rel (!%p10_p5) target bundleno = 1 (0x1), region = 62 }

// kernel: cnn_forward.4
= control target key start
LH: loop header
LB: loop body
LE: loop exit
PB: predicated region body
PF: predicated region fallthrough
CT: control target
= control target key end

     0   :  { %s677_s12 = smov 0   ;;  %s766_s0 = inlined_call_operand.vmem [shape: bf16[288,160], index: 0, kind: input, shape index: {}]   ;;  %s767_s1 = inlined_call_operand.vmem [shape: bf16[160,16], index: 1, kind: input, shape index: {}]   ;;  %s768_s2 = inlined_call_operand.vmem [shape: f32[1,16], index: 2, kind: input, shape index: {}]   ;;  %s769_s3 = inlined_call_operand.vmem [shape: bf16[72,16], index: 3, kind: output, shape index: {}]  }
   0x1 LB: > { %s503_s13 = sadd.s32 4294967295, %s655_s12   ;;  %p507_p0 = scmp.ge.s32.totalorder %s655_s12, 1  ;;  %s655_s12 = sphi %s677_s12, %s13_s12  }
   0x2   : > { %p139_p1 = scmp.lt.s32.totalorder %s655_s12, 4 }
   0x4   : > { %p140_p2 = pnand %p507_p0, %p139_p1 }
   0x5   : > { %s164_s18 = smul.u32 (!%p140_p2), 12, %s503_s13 }
   0x6   : > { %143 = sbr.rel (%p140_p2) target bundleno = 228 (0xe4), region = 32 }
   0x7   : > { %p165_p3 = scmp.lt.s32.totalorder (!%p140_p2), %s164_s18, 35  ;;  %s171_s14 = smul.u32 (!%p140_p2), 3, %s503_s13 }
   0x9   : > { %p172_p4 = scmp.lt.s32.totalorder (!%p140_p2), %s171_s14, 8 }
   0xb   : > { %v627_v0 = vld [vmem:[%s767_s1 + $0x38] sm:$0xff]  ;;  %v629_v1 = vld [vmem:[%s767_s1 + $0x48] sm:$0xff]  ;;  %v626_v2 = vld [vmem:[%s767_s1 + $0x30] sm:$0xff]  ;;  %s771_s18 = smov (!%p165_p3, %s164_s18), 35  ;;  %vm324_vm0 = vcmask 261120   ;;  %s773_s14 = smov (!%p172_p4, %s171_s14), 8 }
   0xc   : > { %343 = vmatpush.bf16.msra.mxu0 %v627_v0  ;;  %630 = vmatpush.bf16.msra.mxu2 %v627_v0  ;;  %v628_v3 = vld [vmem:[%s767_s1 + $0x40] sm:$0xff]  ;;  %v625_v4 = vld [vmem:[%s767_s1 + $0x28] sm:$0xff]  ;;  %s607_s25 = sshll.u32 %s771_s18, 3  ;;  %v623_v12 = vld [vmem:[%s767_s1 + $0x18] sm:$0xff]  ;;  %s510_s13 = sshll.u32 %s773_s14, 2  ;;  %vm443_vm1 = vcmask 125952  }
   0xd   : > { %388 = vmatpush.bf16.msra.mxu1 %v629_v1  ;;  %638 = vmatpush.bf16.msra.mxu3 %v629_v1  ;;  %s705_s28 = scalar_lea.vmem %s766_s0, %s607_s25  ;;  %v624_v8 = vld [vmem:[%s767_s1 + $0x20] sm:$0xff]  ;;  %v622_v13 = vld [vmem:[%s767_s1 + $0x10] sm:$0xff]  ;;  %v621_v16 = vld [vmem:[%s767_s1 + $0x8] sm:$0xff]  ;;  %s175_s19 = scalar_lea.vmem %s769_s3, %s510_s13 }
   0xe   : > { %v608_v5 = vld [vmem:[%s705_s28 + $0x4] sm:$0xf]  ;;  %v515_v6 = vld [vmem:[%s705_s28 + $0x8] sm:$0xf0]  ;;  %v610_v14 = vld [vmem:[%s705_s28 + $0x14] sm:$0xf] }
   0xf   : > { %v518_v7 = vor.u32 %v608_v5, %v515_v6  ;;  %v616_v9 = vld [vmem:[%s705_s28 + $0x44] sm:$0xf]  ;;  %v547_v10 = vld [vmem:[%s705_s28 + $0x48] sm:$0xf0]  ;;  %v523_v15 = vld [vmem:[%s705_s28 + $0x18] sm:$0xf0] }
  0x10   : > { %344 = vmatpush.bf16.msra.mxu0 %v626_v2  ;;  %631 = vmatpush.bf16.msra.mxu2 %v626_v2  ;;  %v550_v11 = vor.u32 %v616_v9, %v547_v10  ;;  %v526_v17 = vor.u32 %v610_v14, %v523_v15  ;;  %v618_v18 = vld [vmem:[%s705_s28 + $0x54] sm:$0xf]  ;;  %v555_v19 = vld [vmem:[%s705_s28 + $0x58] sm:$0xf0]  ;;  %v620_v20 = vld [vmem:[%s767_s1] sm:$0xff] }
  0x11   : > { %389 = vmatpush.bf16.msra.mxu1 %v628_v3  ;;  %639 = vmatpush.bf16.msra.mxu3 %v628_v3  ;;  %v513_v21 = vld [vmem:[%s705_s28] sm:$0xf]  ;;  %v609_v22 = vld [vmem:[%s705_s28 + $0x4] sm:$0xf0]  ;;  %v537_v23 = vld [vmem:[%s705_s28 + $0x30] sm:$0xf]  ;;  %v558_v25 = vor.u32 %v618_v18, %v555_v19 }
  0x12   : > { %v615_v24 = vld [vmem:[%s705_s28 + $0x34] sm:$0xf0]  ;;  %v514_v26 = vor.u32 %v609_v22, %v513_v21  ;;  %v612_v28 = vld [vmem:[%s705_s28 + $0x24] sm:$0xf]  ;;  %v531_v29 = vld [vmem:[%s705_s28 + $0x28] sm:$0xf0] }
  0x13   : > { %v538_v27 = vor.u32 %v615_v24, %v537_v23  ;;  %v534_v30 = vor.u32 %v612_v28, %v531_v29  ;;  %v521_v31 = vld [vmem:[%s705_s28 + $0x10] sm:$0xf]  ;;  %v611_v32 = vld [vmem:[%s705_s28 + $0x14] sm:$0xf0]  ;;  %v545_v33 = vld [vmem:[%s705_s28 + $0x40] sm:$0xf] }
  0x14   : > { %345 = vmatpush.bf16.msra.mxu0 %v625_v4  ;;  %632 = vmatpush.bf16.msra.mxu2 %v625_v4  ;;  %v617_v34 = vld [vmem:[%s705_s28 + $0x44] sm:$0xf0]  ;;  %v522_v35 = vor.u32 %v611_v32, %v521_v31  ;;  %v614_v37 = vld [vmem:[%s705_s28 + $0x34] sm:$0xf]  ;;  %v539_v38 = vld [vmem:[%s705_s28 + $0x38] sm:$0xf0] }
  0x15   : > { %599 = vmatmul.msk.bf16.vlgmr.msra.gmra.mxu1 %vm324_vm0, %v518_v7  ;;  %603 = vmatmul.msk.bf16.vlgmr.msra.gmra.mxu3 %vm324_vm0, %v550_v11  ;;  %v546_v36 = vor.u32 %v617_v34, %v545_v33  ;;  %v542_v39 = vor.u32 %v614_v37, %v539_v38  ;;  %v529_v40 = vld [vmem:[%s705_s28 + $0x20] sm:$0xf]  ;;  %v613_v41 = vld [vmem:[%s705_s28 + $0x24] sm:$0xf0]  ;;  %v553_v42 = vld [vmem:[%s705_s28 + $0x50] sm:$0xf] }
  0x16   : > { %v619_v43 = vld [vmem:[%s705_s28 + $0x54] sm:$0xf0]  ;;  %v530_v44 = vor.u32 %v613_v41, %v529_v40  ;;  %v648_v6 = vld [vmem:[%s768_s2] ss:$0 sm:$0xff] }
  0x17   : > { %v554_v45 = vor.u32 %v619_v43, %v553_v42 }
  0x18   : > { %346 = vmatpush.bf16.msra.mxu0 %v624_v8  ;;  %633 = vmatpush.bf16.msra.mxu2 %v624_v8 }
  0x1c   : > { %347 = vmatpush.bf16.msra.mxu0 %v623_v12  ;;  %634 = vmatpush.bf16.msra.mxu2 %v623_v12 }
  0x20   : > { %348 = vmatpush.bf16.msra.mxu0 %v622_v13  ;;  %635 = vmatpush.bf16.msra.mxu2 %v622_v13 }
  0x24   : > { %349 = vmatpush.bf16.msra.mxu0 %v621_v16  ;;  %636 = vmatpush.bf16.msra.mxu2 %v621_v16 }
  0x25   : > { %600 = vmatmul.msk.bf16.gmra.mxu1 %vm324_vm0, %v526_v17  ;;  %604 = vmatmul.msk.bf16.gmra.mxu3 %vm324_vm0, %v558_v25 }
  0x28   : > { %350 = vmatpush.bf16.msra.mxu0 %v620_v20  ;;  %637 = vmatpush.bf16.msra.mxu2 %v620_v20 }
  0x2b   : > { %351 = vmatmul.bf16.vlgmr.msra.gmra.mxu0 %v514_v26  ;;  %366 = vmatmul.bf16.vlgmr.msra.gmra.mxu2 %v538_v27 }
  0x35   : > { %601 = vmatmul.msk.bf16.gmra.mxu1 %vm324_vm0, %v534_v30 }
  0x3b   : > { %356 = vmatmul.bf16.gmra.mxu0 %v522_v35  ;;  %371 = vmatmul.bf16.gmra.mxu2 %v546_v36 }
  0x45   : > { %602 = vmatmul.msk.bf16.gmra.mxu1 %vm324_vm0, %v542_v39 }
  0x4b   : > { %361 = vmatmul.bf16.gmra.mxu0 %v530_v44  ;;  %376 = vmatmul.bf16.gmra.mxu2 %v554_v45 }
  0x92   : > { %v391_v46 = vpop.f32.mrf.mxu1 }
  0x98   : > { %v411_v55 = vpop.f32.mrf.mxu3 }
  0x9a   : > { %v393_v47 = vpop.f32.mrf.mxu1 }
  0xa0   : > { %v413_v60 = vpop.f32.mrf.mxu3 }
  0xa2   : > { %v396_v48 = vpop.f32.mrf.mxu1 }
  0xa8   : > { %v352_v49 = vpop.f32.mrf.mxu0  ;;  %v416_v8 = vpop.f32.mrf.mxu3 }
  0xa9   : > { %v392_v0 = vadd.f32 %v391_v46, %v352_v49 }
  0xaa   : > { %v398_v50 = vpop.f32.mrf.mxu1 }
  0xae   : > { %v367_v51 = vpop.f32.mrf.mxu2 }
  0xb0   : > { %v354_v52 = vpop.f32.mrf.mxu0  ;;  %v418_v24 = vpop.f32.mrf.mxu3 }
  0xb1   : > { %v394_v13 = vadd.f32 %v393_v47, %v354_v52 }
  0xb2   : > { %v401_v53 = vpop.f32.mrf.mxu1 }
  0xb6   : > { %v369_v54 = vpop.f32.mrf.mxu2 }
  0xb8   : > { %v357_v56 = vpop.f32.mrf.mxu0 }
  0xb9   : > { %v397_v26 = vadd.f32 %v396_v48, %v357_v56 }
  0xba   : > { %v403_v57 = vpop.f32.mrf.mxu1 }
  0xbe   : > { %v372_v58 = vpop.f32.mrf.mxu2 }
  0xbf   : > { %v412_v27 = vadd.f32 %v411_v55, %v372_v58 }
  0xc0   : > { %v359_v59 = vpop.f32.mrf.mxu0 }
  0xc1   : > { %v399_v62 = vadd.f32 %v398_v50, %v359_v59 }
  0xc2   : > { %v406_v61 = vpop.f32.mrf.mxu1 }
  0xc3   : > { %v407_v1 = vadd.f32 %v406_v61, %v367_v51  ;;  %v421_v4 = vmax.f32 %v392_v0, %v399_v62 }
  0xc6   : > { %v374_v63 = vpop.f32.mrf.mxu2 }
  0xc7   : > { %v414_v2 = vadd.f32 %v413_v60, %v374_v63 }
  0xc8   : > { %v362_v3 = vpop.f32.mrf.mxu0 }
  0xc9   : > { %v424_v5 = vmax.f32 %v407_v1, %v414_v2  ;;  %v402_v11 = vadd.f32 %v401_v53, %v362_v3 }
  0xca   : > { %v408_v9 = vpop.f32.mrf.mxu1 }
  0xcb   : > { %v427_v7 = vmax.f32 %v421_v4, %v424_v5  ;;  %v409_v15 = vadd.f32 %v408_v9, %v369_v54  ;;  %v422_v18 = vmax.f32 %v394_v13, %v402_v11 }
  0xcd   : > { %v434_v10 = vadd.f32 %v648_v6, %v427_v7 }
  0xce   : > { %v377_v12 = vpop.f32.mrf.mxu2 }
  0xcf   : > { %v437_v14 = vmax.f32 %v434_v10, 0.0  ;;  %v417_v16 = vadd.f32 %v416_v8, %v377_v12 }
  0xd0   : > { %v364_v20 = vpop.f32.mrf.mxu0 }
  0xd1   : > { %v440_v17 = vpack.c.bf16 %v437_v14, %v437_v14  ;;  %v425_v19 = vmax.f32 %v409_v15, %v417_v16  ;;  %v404_v23 = vadd.f32 %v403_v57, %v364_v20 }
  0xd3   : > { %444 = vst.msk [vmem:[%s175_s19] sm:$0xf] %vm443_vm1, %v440_v17  ;;  %v428_v21 = vmax.f32 %v422_v18, %v425_v19  ;;  %v423_v31 = vmax.f32 %v397_v26, %v404_v23 }
  0xd5   : > { %v435_v22 = vadd.f32 %v648_v6, %v428_v21 }
  0xd6   : > { %v379_v25 = vpop.f32.mrf.mxu2 }
  0xd7   : > { %v438_v28 = vmax.f32 %v435_v22, 0.0  ;;  %v419_v29 = vadd.f32 %v418_v24, %v379_v25 }
  0xd9   : > { %v441_v30 = vpack.c.bf16 %v438_v28, %v438_v28  ;;  %v426_v32 = vmax.f32 %v412_v27, %v419_v29 }
  0xdb   : > { %445 = vst.msk [vmem:[%s175_s19 + $0x4] sm:$0xf] %vm443_vm1, %v441_v30  ;;  %v429_v33 = vmax.f32 %v423_v31, %v426_v32 }
  0xdd   : > { %v436_v34 = vadd.f32 %v648_v6, %v429_v33 }
  0xdf   : > { %v439_v35 = vmax.f32 %v436_v34, 0.0 }
  0xe1   : > { %v442_v36 = vpack.c.bf16 %v439_v35, %v439_v35 }
  0xe3   : > { %446 = vst.msk [vmem:[%s175_s19 + $0x8] sm:$0xf] %vm443_vm1, %v442_v36 }
  0xe4 PF: > { %s13_s12 = sadd.s32 1, %s655_s12  }
  0xe5   : > { %p10_p5 = scmp.ge.s32.totalorder %s13_s12, 5  }
  0xe7   :  { %12 = sbr.rel (!%p10_p5) target bundleno = 1 (0x1), region = 62 }

// kernel: cnn_forward.5
= control target key start
LH: loop header
LB: loop body
LE: loop exit
PB: predicated region body
PF: predicated region fallthrough
CT: control target
= control target key end

     0   :  { %vm478_vm0 = vcmask 1043456   ;;  %vm339_vm1 = vcmask 523264   ;;  %vm549_vm2 = vcmask 1041408   ;;  %vm474_vm3 = vcmask 982016   ;;  %s1029_s1 = inlined_call_operand.vmem [shape: bf16[576,120], index: 1, kind: input, shape index: {}]   ;;  %s1030_s2 = inlined_call_operand.vmem [shape: f32[1,120], index: 2, kind: input, shape index: {}]   ;;  %s1031_s3 = inlined_call_operand.vmem [shape: bf16[120,84], index: 3, kind: input, shape index: {}]   ;;  %s1032_s0 = inlined_call_operand.vmem [shape: bf16[8,576], index: 0, kind: input, shape index: {}]   ;;  %s1033_s4 = inlined_call_operand.vmem [shape: f32[1,84], index: 4, kind: input, shape index: {}]   ;;  %s1034_s5 = inlined_call_operand.vmem [shape: bf16[84,10], index: 5, kind: input, shape index: {}]   ;;  %s1035_s6 = inlined_call_operand.vmem [shape: f32[1,10], index: 6, kind: input, shape index: {}]   ;;  %s1036_s7 = inlined_call_operand.vmem [shape: f32[8,10], index: 7, kind: output, shape index: {}]  }
   0x1   :  { %v774_v0 = vld [vmem:[%s1029_s1 + $0x38] sm:$0xff]  ;;  %v773_v4 = vld [vmem:[%s1029_s1 + $0x30] sm:$0xff]  ;;  %v772_v8 = vld [vmem:[%s1029_s1 + $0x28] sm:$0xff]  ;;  %vm545_vm4 = vcmask 687104   ;;  %vm566_vm5 = vcmask 80896  }
   0x2   :  { %v790_v1 = vld [vmem:[%s1029_s1 + $0xb8] sm:$0xff]  ;;  %343 = vmatpush.bf16.msra.mxu0 %v774_v0  ;;  %v789_v5 = vld [vmem:[%s1029_s1 + $0xb0] sm:$0xff]  ;;  %v788_v9 = vld [vmem:[%s1029_s1 + $0xa8] sm:$0xff] }
   0x3   :  { %v798_v2 = vld [vmem:[%s1029_s1 + $0xf8] sm:$0xff]  ;;  %369 = vmatpush.bf16.msra.mxu2 %v790_v1  ;;  %v797_v6 = vld [vmem:[%s1029_s1 + $0xf0] sm:$0xff]  ;;  %v796_v10 = vld [vmem:[%s1029_s1 + $0xe8] sm:$0xff] }
   0x4   :  { %v782_v3 = vld [vmem:[%s1029_s1 + $0x78] sm:$0xff]  ;;  %382 = vmatpush.bf16.msra.mxu3 %v798_v2  ;;  %v781_v7 = vld [vmem:[%s1029_s1 + $0x70] sm:$0xff]  ;;  %v780_v11 = vld [vmem:[%s1029_s1 + $0x68] sm:$0xff] }
   0x5   :  { %356 = vmatpush.bf16.msra.mxu1 %v782_v3  ;;  %v771_v12 = vld [vmem:[%s1029_s1 + $0x20] sm:$0xff]  ;;  %v770_v16 = vld [vmem:[%s1029_s1 + $0x18] sm:$0xff]  ;;  %v769_v20 = vld [vmem:[%s1029_s1 + $0x10] sm:$0xff] }
   0x6   :  { %344 = vmatpush.bf16.msra.mxu0 %v773_v4  ;;  %v787_v13 = vld [vmem:[%s1029_s1 + $0xa0] sm:$0xff]  ;;  %v786_v17 = vld [vmem:[%s1029_s1 + $0x98] sm:$0xff]  ;;  %v785_v21 = vld [vmem:[%s1029_s1 + $0x90] sm:$0xff] }
   0x7   :  { %370 = vmatpush.bf16.msra.mxu2 %v789_v5  ;;  %v795_v14 = vld [vmem:[%s1029_s1 + $0xe0] sm:$0xff]  ;;  %v794_v18 = vld [vmem:[%s1029_s1 + $0xd8] sm:$0xff]  ;;  %v793_v23 = vld [vmem:[%s1029_s1 + $0xd0] sm:$0xff] }
   0x8   :  { %383 = vmatpush.bf16.msra.mxu3 %v797_v6  ;;  %v779_v15 = vld [vmem:[%s1029_s1 + $0x60] sm:$0xff]  ;;  %v778_v19 = vld [vmem:[%s1029_s1 + $0x58] sm:$0xff]  ;;  %v777_v24 = vld [vmem:[%s1029_s1 + $0x50] sm:$0xff] }
   0x9   :  { %357 = vmatpush.bf16.msra.mxu1 %v781_v7  ;;  %v424_v22 = vld [vmem:[%s1031_s3 + $0x38] sm:$0xf]  ;;  %v768_v25 = vld [vmem:[%s1029_s1 + $0x8] sm:$0xff]  ;;  %v27_v28 = vld [vmem:[%s1032_s0] sm:$0xff] }
   0xa   :  { %345 = vmatpush.bf16.msra.mxu0 %v772_v8  ;;  %v458_v26 = vunpack.c.l.b16 %v424_v22  ;;  %v784_v27 = vld [vmem:[%s1029_s1 + $0x88] sm:$0xff]  ;;  %v109_v32 = vunpack.c.l.b16 %v27_v28  ;;  %v767_v35 = vld [vmem:[%s1029_s1] sm:$0xff]  ;;  %v110_v38 = vunpack.c.h.b16 %v27_v28  ;;  %v802_v41 = vld [vmem:[%s1029_s1 + $0x118] sm:$0xff] }
   0xb   :  { %371 = vmatpush.bf16.msra.mxu2 %v788_v9  ;;  %v28_v29 = vld [vmem:[%s1032_s0 + $0x8] sm:$0xff]  ;;  %v783_v36 = vld [vmem:[%s1029_s1 + $0x80] sm:$0xff]  ;;  %v801_v47 = vld [vmem:[%s1029_s1 + $0x110] sm:$0xff] }
   0xc   :  { %384 = vmatpush.bf16.msra.mxu3 %v796_v10  ;;  %v792_v30 = vld [vmem:[%s1029_s1 + $0xc8] sm:$0xff]  ;;  %v111_v33 = vunpack.c.l.b16 %v28_v29  ;;  %v466_v34 = vpack.c.b16 %v458_v26, %v458_v26  ;;  %v112_v37 = vunpack.c.h.b16 %v28_v29  ;;  %v791_v39 = vld [vmem:[%s1029_s1 + $0xc0] sm:$0xff]  ;;  %v114_v42 = vpack.c.b16 %v109_v32, %v109_v32  ;;  %v809_v48 = vld [vmem:[%s1031_s3 + $0x30] sm:$0xff] }
   0xd   :  { %358 = vmatpush.bf16.msra.mxu1 %v780_v11  ;;  %v776_v31 = vld [vmem:[%s1029_s1 + $0x48] sm:$0xff]  ;;  %v775_v40 = vld [vmem:[%s1029_s1 + $0x40] sm:$0xff]  ;;  %v115_v46 = vpack.c.b16 %v110_v38, %v110_v38  ;;  %v29_v50 = vld [vmem:[%s1032_s0 + $0x10] sm:$0xf] }
   0xe   :  { %346 = vmatpush.bf16.msra.mxu0 %v771_v12  ;;  %v116_v43 = vpack.c.b16 %v111_v33, %v111_v33  ;;  %v480_v44 = vsel %vm478_vm0, %v466_v34, 0  ;;  %v117_v45 = vpack.c.b16 %v112_v37, %v112_v37  ;;  %v800_v49 = vld [vmem:[%s1029_s1 + $0x108] sm:$0xff]  ;;  %v799_v51 = vld [vmem:[%s1029_s1 + $0x100] sm:$0xff]  ;;  %v113_v52 = vunpack.c.l.b16 %v29_v50  ;;  %v806_v56 = vld [vmem:[%s1031_s3 + $0x18] sm:$0xff] }
   0xf   :  { %372 = vmatpush.bf16.msra.mxu2 %v787_v13  ;;  %v808_v54 = vld [vmem:[%s1031_s3 + $0x28] sm:$0xff]  ;;  %v807_v55 = vld [vmem:[%s1031_s3 + $0x20] sm:$0xff]  ;;  %v805_v57 = vld [vmem:[%s1031_s3 + $0x10] sm:$0xff] }
  0x10   :  { %385 = vmatpush.bf16.msra.mxu3 %v795_v14  ;;  %v118_v53 = vpack.c.b16 %v113_v52, %v113_v52  ;;  %v804_v58 = vld [vmem:[%s1031_s3 + $0x8] sm:$0xff]  ;;  %v803_v59 = vld [vmem:[%s1031_s3] sm:$0xff]  ;;  %v813_v4 = vld [vmem:[%s1034_s5 + $0x18] sm:$0xff] }
  0x11   :  { %359 = vmatpush.bf16.msra.mxu1 %v779_v15  ;;  %v507_v60 = vld [vmem:[%s1034_s5 + $0x28] sm:$0x3]  ;;  %v814_v0 = vld [vmem:[%s1034_s5 + $0x20] sm:$0xff]  ;;  %v812_v7 = vld [vmem:[%s1034_s5 + $0x10] sm:$0xff] }
  0x12   :  { %347 = vmatpush.bf16.msra.mxu0 %v770_v16  ;;  %v533_v61 = vunpack.c.l.b16 %v507_v60  ;;  %v815_v2 = vld [vmem:[%s1030_s2] ss:$0 sm:$0xff] }
  0x13   :  { %373 = vmatpush.bf16.msra.mxu2 %v786_v17  ;;  %v810_v22 = vld [vmem:[%s1034_s5] sm:$0xff] }
  0x14   :  { %386 = vmatpush.bf16.msra.mxu3 %v794_v18  ;;  %v539_v62 = vpack.c.b16 %v533_v61, %v533_v61  ;;  %v817_v29 = vld [vmem:[%s1035_s6] ss:$0 sm:$0xff] }
  0x15   :  { %360 = vmatpush.bf16.msra.mxu1 %v778_v19 }
  0x16   :  { %348 = vmatpush.bf16.msra.mxu0 %v769_v20  ;;  %v551_v63 = vsel %vm549_vm2, %v539_v62, 0 }
  0x17   :  { %374 = vmatpush.bf16.msra.mxu2 %v785_v21  ;;  %v811_v21 = vld [vmem:[%s1034_s5 + $0x8] sm:$0xff] }
  0x18   :  { %387 = vmatpush.bf16.msra.mxu3 %v793_v23  ;;  %v816_v23 = vld [vmem:[%s1033_s4] ss:$0 sm:$0xff] }
  0x19   :  { %361 = vmatpush.bf16.msra.mxu1 %v777_v24 }
  0x1a   :  { %349 = vmatpush.bf16.msra.mxu0 %v768_v25 }
  0x1b   :  { %375 = vmatpush.bf16.msra.mxu2 %v784_v27 }
  0x1c   :  { %388 = vmatpush.bf16.msra.mxu3 %v792_v30 }
  0x1d   :  { %362 = vmatpush.bf16.msra.mxu1 %v776_v31 }
  0x1e   :  { %350 = vmatpush.bf16.msra.mxu0 %v767_v35 }
  0x1f   :  { %376 = vmatpush.bf16.msra.mxu2 %v783_v36 }
  0x20   :  { %389 = vmatpush.bf16.msra.mxu3 %v791_v39 }
  0x21   :  { %363 = vmatpush.bf16.msra.mxu1 %v775_v40  ;;  %351 = vmatmul.bf16.vlgmr.msra.gmra.mxu0 %v114_v42 }
  0x22   :  { %399 = vmatpush.bf16.msrb.mxu0 %v802_v41  ;;  %377 = vmatmul.bf16.vlgmr.msra.gmra.mxu2 %v116_v43 }
  0x23   :  { %390 = vmatmul.bf16.vlgmr.msra.gmra.mxu3 %v117_v45  ;;  %555 = vmatpush.bf16.msrb.mxu2 %v551_v63 }
  0x24   :  { %364 = vmatmul.bf16.vlgmr.msra.gmra.mxu1 %v115_v46 }
  0x25   :  { %482 = vmatpush.bf16.msrb.mxu1 %v480_v44 }
  0x26   :  { %400 = vmatpush.bf16.msrb.mxu0 %v801_v47 }
  0x27   :  { %556 = vmatpush.bf16.msrb.mxu2 %v814_v0 }
  0x29   :  { %483 = vmatpush.bf16.msrb.mxu1 %v809_v48 }
  0x2a   :  { %401 = vmatpush.bf16.msrb.mxu0 %v800_v49 }
  0x2b   :  { %557 = vmatpush.bf16.msrb.mxu2 %v813_v4 }
  0x2d   :  { %484 = vmatpush.bf16.msrb.mxu1 %v808_v54 }
  0x2e   :  { %402 = vmatpush.bf16.msrb.mxu0 %v799_v51 }
  0x2f   :  { %558 = vmatpush.bf16.msrb.mxu2 %v812_v7 }
  0x31   :  { %716 = vmatmul.msk.bf16.vlgmr.msrb.gmra.mxu0 %vm339_vm1, %v118_v53  ;;  %485 = vmatpush.bf16.msrb.mxu1 %v807_v55 }
  0x33   :  { %559 = vmatpush.bf16.msrb.mxu2 %v811_v21 }
  0x35   :  { %486 = vmatpush.bf16.msrb.mxu1 %v806_v56 }
  0x37   :  { %560 = vmatpush.bf16.msrb.mxu2 %v810_v22 }
  0x39   :  { %487 = vmatpush.bf16.msrb.mxu1 %v805_v57 }
  0x3d   :  { %488 = vmatpush.bf16.msrb.mxu1 %v804_v58 }
  0x41   :  { %489 = vmatpush.bf16.msrb.mxu1 %v803_v59 }
  0x9e   :  { %v352_v1 = vpop.f32.mrf.mxu0 }
  0x9f   :  { %v353_v5 = vadd.f32 %v815_v2, %v352_v1 }
  0xa1   :  { %v365_v3 = vpop.f32.mrf.mxu1 }
  0xa2   :  { %v366_v10 = vadd.f32 %v365_v3, %v353_v5 }
  0xa5   :  { %v378_v6 = vpop.f32.mrf.mxu2 }
  0xa6   :  { %v391_v8 = vpop.f32.mrf.mxu3  ;;  %v354_v9 = vpop.f32.mrf.mxu0  ;;  %v379_v12 = vadd.f32 %v378_v6, %v366_v10 }
  0xa8   :  { %v392_v14 = vadd.f32 %v391_v8, %v379_v12 }
  0xa9   :  { %v367_v11 = vpop.f32.mrf.mxu1 }
  0xad   :  { %v380_v13 = vpop.f32.mrf.mxu2 }
  0xae   :  { %v393_v15 = vpop.f32.mrf.mxu3  ;;  %v404_v16 = vpop.f32.mrf.mxu0 }
  0xaf   :  { %v405_v17 = vadd.f32 %v404_v16, %v392_v14 }
  0xb1   :  { %v408_v18 = vmax.f32 %v405_v17, 0.0 }
  0xb3   :  { %v409_v19 = vpack.c.bf16 %v408_v18, %v408_v18 }
  0xb5   :  { %745 = vmatmul.msk.bf16.vlgmr.msrb.gmra.mxu1 %vm474_vm3, %v409_v19 }
  0xb6   :  { %v406_v20 = vpop.f32.mrf.mxu0 }
 0x132   :  { %v491_v24 = vpop.f32.mrf.mxu1 }
 0x133   :  { %v492_v25 = vadd.f32 %v816_v23, %v491_v24 }
 0x135   :  { %v495_v26 = vmax.f32 %v492_v25, 0.0 }
 0x137   :  { %v496_v27 = vpack.c.bf16 %v495_v26, %v495_v26 }
 0x139   :  { %766 = vmatmul.msk.bf16.vlgmr.msrb.gmra.mxu2 %vm545_vm4, %v496_v27 }
 0x13a   :  { %v493_v28 = vpop.f32.mrf.mxu1 }
 0x1bc   :  { %v562_v30 = vpop.f32.mrf.mxu2 }
 0x1bd   :  { %v563_v31 = vadd.f32 %v817_v29, %v562_v30 }
 0x1bf   :  { %567 = vst.msk [vmem:[%s1036_s7] sm:$0xff] %vm566_vm5, %v563_v31 }
 0x1c4   :  { %v564_v32 = vpop.f32.mrf.mxu2 }

</bundles_post_ra>
